<compile_context>
chip_gen: v7x
topology: tpu7x:2x2x1
jax: 0.10.0
libtpu: 0.0.40
codegen_flags: <defaults>
</compile_context>

<pallas_src>
import jax
import jax.numpy as jnp
from jax.experimental import pallas as pl
from jax.experimental.pallas import tpu as pltpu

SUBLANE = 8  # batch tile must be a multiple of the sublane width


def _round_up(x, m):
    return ((x + m - 1) // m) * m


def _tensorcores_per_device():
    """TensorCores a 'parallel' grid axis can shard across on this device."""
    try:
        kind = jax.devices()[0].device_kind.lower()
    except Exception:
        return 1
    # v7x exposes 2 TensorCores per chip; v5e/v6e are single-core.
    return 2 if "v7" in kind else 1


def _pick_batch_tile(batch, n_cores):
    b8 = _round_up(batch, SUBLANE)
    if n_cores <= 1:
        # v5e/v6e: biggest tile up to 512 rows (measured ~85% of HBM roofline
        # at tile 512 vs ~63% at 256) and fewer per-step grid overheads.
        return min(b8, 512)
    # v7x: aim for >= 2 grid steps per core so both cores share the batch AND
    # each core still pipelines the dominant output writeback.
    tile = _round_up(pl.cdiv(b8, 2 * n_cores), SUBLANE)
    return max(SUBLANE, min(tile, 256))


def decoder_kernel(z_ref, w1_ref, b1_ref, w2_ref, b2_ref, w3_ref, b3_ref, out_ref):
    # fc1: Linear + ReLU (Dropout == identity at inference).
    # bf16 MXU operands (z pre-cast in the wrapper), f32 accumulation;
    # bias add / ReLU stay in f32 (v5e VPU has no bf16).
    h1 = jnp.dot(z_ref[...], w1_ref[...], preferred_element_type=jnp.float32)
    h1 = jnp.maximum(h1 + b1_ref[...], 0.0)

    # fc2: Linear + ReLU (Dropout == identity at inference).
    h2 = jnp.dot(h1.astype(jnp.bfloat16), w2_ref[...],
                 preferred_element_type=jnp.float32)
    h2 = jnp.maximum(h2 + b2_ref[...], 0.0)

    # fc3: Linear + sigmoid.  exp on the EUP; approx reciprocal keeps the
    # divide off the VALU (the EUP slot is otherwise idle).
    logits = jnp.dot(h2.astype(jnp.bfloat16), w3_ref[...],
                     preferred_element_type=jnp.float32) + b3_ref[...]
    out_ref[...] = pl.reciprocal(1.0 + jnp.exp(-logits),
                                 approx=True).astype(out_ref.dtype)


def prepack_decoder_params(w1, b1, w2, b2, w3, b3):
    """One-time prep (do NOT call per forward): bf16 weights, (1, out) f32 biases.

    Weights are expected in (in_features, out_features) layout, i.e. the
    transpose of the PyTorch nn.Linear weight.
    """
    pack_w = lambda w: jnp.asarray(w).astype(jnp.bfloat16)
    pack_b = lambda b: jnp.asarray(b, jnp.float32).reshape(1, -1)
    return (pack_w(w1), pack_b(b1), pack_w(w2), pack_b(b2), pack_w(w3), pack_b(b3))


def decoder_forward(z, w1, b1, w2, b2, w3, b3, *, batch_tile=None):
    """z: (B, latent).  w*: (in, out) bf16 (pre-packed).  b*: (1, out) f32.
    Returns the sigmoid MLP output of shape (B, input_dim), f32."""
    B, latent_dim = z.shape
    hidden_dim = w1.shape[1]
    input_dim = w3.shape[1]

    if batch_tile is None:
        batch_tile = _pick_batch_tile(B, _tensorcores_per_device())
    batch_tile = _round_up(batch_tile, SUBLANE)
    B_pad = _round_up(B, batch_tile)
    grid = (B_pad // batch_tile,)

    # Only per-call prep: cast z to bf16 (halves its DMA) and, when needed,
    # zero-pad rows so the batch divides the tile.  No feature-dim padding.
    z_p = z.astype(jnp.bfloat16)
    if B_pad != B:
        z_p = jnp.pad(z_p, ((0, B_pad - B), (0, 0)))

    # Explicit VMEM budget (comfortably inside v7x's 64 MiB as well as the
    # 128 MiB of v5e/v6e); guards against huge input_dim at tile 512.
    f32b, bf16b = 4, 2
    weight_bytes = (latent_dim * hidden_dim + hidden_dim * hidden_dim
                    + hidden_dim * input_dim) * bf16b \
                   + (2 * hidden_dim + input_dim) * f32b
    io_bytes = batch_tile * (latent_dim * bf16b + input_dim * f32b)
    live_bytes = batch_tile * (2 * hidden_dim + 2 * input_dim) * f32b
    budget = 2 * (weight_bytes + io_bytes) + live_bytes  # x2 ~= double buffers
    vmem_limit = int(min(64 << 20, max(16 << 20, 2 * budget)))

    # Weights/biases are small and constant across the grid: full-array blocks
    # with constant index maps (no re-fetch across steps).
    full = lambda shape: pl.BlockSpec(shape, lambda i: (0,) * len(shape))

    out = pl.pallas_call(
        decoder_kernel,
        out_shape=jax.ShapeDtypeStruct((B_pad, input_dim), jnp.float32),
        grid=grid,
        in_specs=[
            pl.BlockSpec((batch_tile, latent_dim), lambda i: (i, 0)),  # z tile
            full((latent_dim, hidden_dim)),                            # W1 bf16
            full((1, hidden_dim)),                                     # b1
            full((hidden_dim, hidden_dim)),                            # W2 bf16
            full((1, hidden_dim)),                                     # b2
            full((hidden_dim, input_dim)),                             # W3 bf16
            full((1, input_dim)),                                      # b3
        ],
        out_specs=pl.BlockSpec((batch_tile, input_dim), lambda i: (i, 0)),
        compiler_params=pltpu.CompilerParams(
            dimension_semantics=("parallel",),
            vmem_limit_bytes=vmem_limit,
        ),
    )(z_p, w1, b1, w2, b2, w3, b3)

    if B_pad != B:
        out = out[:B]
    return out


def init_linear(key, in_features, out_features):
    """Deterministic init mimicking nn.Linear (uniform +/- 1/sqrt(in)).
    Weight stored as (in, out) == transposed PyTorch weight."""
    kw, kb = jax.random.split(key)
    bound = 1.0 / jnp.sqrt(in_features)
    w = jax.random.uniform(kw, (in_features, out_features), jnp.float32, -bound, bound)
    b = jax.random.uniform(kb, (1, out_features), jnp.float32, -bound, bound)
    return w, b


def reference_forward(z, w1, b1, w2, b2, w3, b3):
    """Pure-JAX reference mirroring the kernel's bf16-operand / f32-accumulate
    matmuls (exact sigmoid; the kernel's approx reciprocal differs by <~4e-3)."""
    bf = lambda x: x.astype(jnp.bfloat16).astype(jnp.float32)
    hp = jax.lax.Precision.HIGHEST
    h1 = jnp.maximum(jnp.dot(bf(z), bf(w1), precision=hp) + b1, 0.0)
    h2 = jnp.maximum(jnp.dot(bf(h1), bf(w2), precision=hp) + b2, 0.0)
    return jax.nn.sigmoid(jnp.dot(bf(h2), bf(w3), precision=hp) + b3)


if __name__ == "__main__":
    # Small MNIST-style decoder: batch=64, latent=16, hidden=64, input_dim=784.
    B, latent_dim, hidden_dim, input_dim = 64, 16, 64, 784

    key = jax.random.PRNGKey(0)
    kz, k1, k2, k3 = jax.random.split(key, 4)

    z = jax.random.normal(kz, (B, latent_dim), jnp.float32)
    w1, b1 = init_linear(k1, latent_dim, hidden_dim)
    w2, b2 = init_linear(k2, hidden_dim, hidden_dim)
    w3, b3 = init_linear(k3, hidden_dim, input_dim)

    params = prepack_decoder_params(w1, b1, w2, b2, w3, b3)  # one-time prep
    fwd = jax.jit(decoder_forward)

    out = jax.block_until_ready(fwd(z, *params))

    ref = reference_forward(z, w1, b1, w2, b2, w3, b3)
    assert out.shape == (B, input_dim)
    max_err = float(jnp.max(jnp.abs(out - ref)))
    assert max_err < 1e-2, f"max abs err {max_err}"

    print("KERNEL_OK")
</pallas_src>

<mosaic_0001>
module attributes {stable_mosaic.version = 11 : i64} {
  func.func @decoder_kernel(%arg0: i32, %arg1: memref<64x16xbf16, #tpu.memory_space<vmem>>, %arg2: memref<16x64xbf16, #tpu.memory_space<vmem>>, %arg3: memref<1x64xf32, #tpu.memory_space<vmem>>, %arg4: memref<64x64xbf16, #tpu.memory_space<vmem>>, %arg5: memref<1x64xf32, #tpu.memory_space<vmem>>, %arg6: memref<64x784xbf16, #tpu.memory_space<vmem>>, %arg7: memref<1x784xf32, #tpu.memory_space<vmem>>, %arg8: memref<64x784xf32, #tpu.memory_space<vmem>>) attributes {dimension_semantics = [#tpu.dimension_semantics<parallel>], iteration_bounds = array<i64: 1>, scalar_prefetch = 0 : i64, scratch_operands = 0 : i64, tpu.core_type = #tpu.core_type<tc>, window_params = [{transform_indices = @transform_0, window_bounds = array<i64: 64, 16>}, {pipeline_mode = #tpu.pipeline_mode<synchronous>, transform_indices = @transform_1, window_bounds = array<i64: 16, 64>}, {pipeline_mode = #tpu.pipeline_mode<synchronous>, transform_indices = @transform_2, window_bounds = array<i64: 1, 64>}, {pipeline_mode = #tpu.pipeline_mode<synchronous>, transform_indices = @transform_3, window_bounds = array<i64: 64, 64>}, {pipeline_mode = #tpu.pipeline_mode<synchronous>, transform_indices = @transform_4, window_bounds = array<i64: 1, 64>}, {pipeline_mode = #tpu.pipeline_mode<synchronous>, transform_indices = @transform_5, window_bounds = array<i64: 64, 784>}, {pipeline_mode = #tpu.pipeline_mode<synchronous>, transform_indices = @transform_6, window_bounds = array<i64: 1, 784>}, {transform_indices = @transform_7, window_bounds = array<i64: 64, 784>}]} {
    %c0 = arith.constant 0 : index
    %c0_0 = arith.constant 0 : index
    %0 = vector.load %arg1[%c0, %c0_0] : memref<64x16xbf16, #tpu.memory_space<vmem>>, vector<64x16xbf16>
    %c0_1 = arith.constant 0 : index
    %c0_2 = arith.constant 0 : index
    %1 = vector.load %arg2[%c0_1, %c0_2] : memref<16x64xbf16, #tpu.memory_space<vmem>>, vector<16x64xbf16>
    %cst = arith.constant dense<0.000000e+00> : vector<64x64xf32>
    %2 = tpu.matmul %0, %1, %cst {dimension_numbers = #tpu.dot_dimension_numbers<[1], [0], [0], [1], [0, 0, 1, 1], [], []>} : vector<64x16xbf16>, vector<16x64xbf16>, vector<64x64xf32> -> vector<64x64xf32>
    %c0_3 = arith.constant 0 : index
    %c0_4 = arith.constant 0 : index
    %3 = vector.load %arg3[%c0_3, %c0_4] : memref<1x64xf32, #tpu.memory_space<vmem>>, vector<1x64xf32>
    %4 = vector.broadcast %3 : vector<1x64xf32> to vector<64x64xf32>
    %5 = arith.addf %2, %4 : vector<64x64xf32>
    %cst_5 = arith.constant 0.000000e+00 : f32
    %6 = vector.broadcast %cst_5 : f32 to vector<64x64xf32>
    %7 = arith.maximumf %5, %6 : vector<64x64xf32>
    %8 = arith.truncf %7 : vector<64x64xf32> to vector<64x64xbf16>
    %c0_6 = arith.constant 0 : index
    %c0_7 = arith.constant 0 : index
    %9 = vector.load %arg4[%c0_6, %c0_7] : memref<64x64xbf16, #tpu.memory_space<vmem>>, vector<64x64xbf16>
    %cst_8 = arith.constant dense<0.000000e+00> : vector<64x64xf32>
    %10 = tpu.matmul %8, %9, %cst_8 {dimension_numbers = #tpu.dot_dimension_numbers<[1], [0], [0], [1], [0, 0, 1, 1], [], []>} : vector<64x64xbf16>, vector<64x64xbf16>, vector<64x64xf32> -> vector<64x64xf32>
    %c0_9 = arith.constant 0 : index
    %c0_10 = arith.constant 0 : index
    %11 = vector.load %arg5[%c0_9, %c0_10] : memref<1x64xf32, #tpu.memory_space<vmem>>, vector<1x64xf32>
    %12 = vector.broadcast %11 : vector<1x64xf32> to vector<64x64xf32>
    %13 = arith.addf %10, %12 : vector<64x64xf32>
    %cst_11 = arith.constant 0.000000e+00 : f32
    %14 = vector.broadcast %cst_11 : f32 to vector<64x64xf32>
    %15 = arith.maximumf %13, %14 : vector<64x64xf32>
    %16 = arith.truncf %15 : vector<64x64xf32> to vector<64x64xbf16>
    %c0_12 = arith.constant 0 : index
    %c0_13 = arith.constant 0 : index
    %17 = vector.load %arg6[%c0_12, %c0_13] : memref<64x784xbf16, #tpu.memory_space<vmem>>, vector<64x784xbf16>
    %cst_14 = arith.constant dense<0.000000e+00> : vector<64x784xf32>
    %18 = tpu.matmul %16, %17, %cst_14 {dimension_numbers = #tpu.dot_dimension_numbers<[1], [0], [0], [1], [0, 0, 1, 1], [], []>} : vector<64x64xbf16>, vector<64x784xbf16>, vector<64x784xf32> -> vector<64x784xf32>
    %c0_15 = arith.constant 0 : index
    %c0_16 = arith.constant 0 : index
    %19 = vector.load %arg7[%c0_15, %c0_16] : memref<1x784xf32, #tpu.memory_space<vmem>>, vector<1x784xf32>
    %20 = vector.broadcast %19 : vector<1x784xf32> to vector<64x784xf32>
    %21 = arith.addf %18, %20 : vector<64x784xf32>
    %cst_17 = arith.constant 0.000000e+00 : f32
    %22 = vector.broadcast %cst_17 : f32 to vector<64x784xf32>
    %23 = arith.subf %22, %21 : vector<64x784xf32>
    %24 = math.exp %23 : vector<64x784xf32>
    %cst_18 = arith.constant 1.000000e+00 : f32
    %25 = vector.broadcast %cst_18 : f32 to vector<64x784xf32>
    %26 = arith.addf %25, %24 : vector<64x784xf32>
    %27 = tpu.reciprocal %26 {approx = true} : vector<64x784xf32> -> vector<64x784xf32>
    %c0_19 = arith.constant 0 : index
    %c0_20 = arith.constant 0 : index
    %28 = vector.load %arg8[%c0_19, %c0_20] : memref<64x784xf32, #tpu.memory_space<vmem>>, vector<64x784xf32>
    tpu.vector_store %arg8[%c0_19, %c0_20], %27 {strides = array<i32>} : memref<64x784xf32, #tpu.memory_space<vmem>>, vector<64x784xf32>,
    return
  }
  func.func @transform_0(%arg0: i32) -> (i32, i32) {
    %c0_i32 = arith.constant 0 : i32
    %c0_i32_0 = arith.constant 0 : i32
    return %arg0, %c0_i32 : i32, i32
  }
  func.func @transform_1(%arg0: i32) -> (i32, i32) {
    %c0_i32 = arith.constant 0 : i32
    %c0_i32_0 = arith.constant 0 : i32
    %c0_i32_1 = arith.constant 0 : i32
    return %c0_i32, %c0_i32_0 : i32, i32
  }
  func.func @transform_2(%arg0: i32) -> (i32, i32) {
    %c0_i32 = arith.constant 0 : i32
    %c0_i32_0 = arith.constant 0 : i32
    %c0_i32_1 = arith.constant 0 : i32
    return %c0_i32, %c0_i32_0 : i32, i32
  }
  func.func @transform_3(%arg0: i32) -> (i32, i32) {
    %c0_i32 = arith.constant 0 : i32
    %c0_i32_0 = arith.constant 0 : i32
    %c0_i32_1 = arith.constant 0 : i32
    return %c0_i32, %c0_i32_0 : i32, i32
  }
  func.func @transform_4(%arg0: i32) -> (i32, i32) {
    %c0_i32 = arith.constant 0 : i32
    %c0_i32_0 = arith.constant 0 : i32
    %c0_i32_1 = arith.constant 0 : i32
    return %c0_i32, %c0_i32_0 : i32, i32
  }
  func.func @transform_5(%arg0: i32) -> (i32, i32) {
    %c0_i32 = arith.constant 0 : i32
    %c0_i32_0 = arith.constant 0 : i32
    %c0_i32_1 = arith.constant 0 : i32
    return %c0_i32, %c0_i32_0 : i32, i32
  }
  func.func @transform_6(%arg0: i32) -> (i32, i32) {
    %c0_i32 = arith.constant 0 : i32
    %c0_i32_0 = arith.constant 0 : i32
    %c0_i32_1 = arith.constant 0 : i32
    return %c0_i32, %c0_i32_0 : i32, i32
  }
  func.func @transform_7(%arg0: i32) -> (i32, i32) {
    %c0_i32 = arith.constant 0 : i32
    %c0_i32_0 = arith.constant 0 : i32
    return %arg0, %c0_i32 : i32, i32
  }
}

</mosaic_0001>

<bundles_post_ra>
// kernel: decoder_forward.1
= control target key start
LH: loop header
LB: loop body
LE: loop exit
PB: predicated region body
PF: predicated region fallthrough
CT: control target
= control target key end

     0   :  { %12 = vsyncpa [#allocation3], 0  ;;  %s1949_s0 = inlined_call_operand.vmem [shape: bf16[64,16], index: 0, kind: input, shape index: {}]   ;;  %s1950_s1 = inlined_call_operand.vmem [shape: bf16[16,64], index: 1, kind: input, shape index: {}]   ;;  %s1951_s2 = inlined_call_operand.vmem [shape: f32[1,64], index: 2, kind: input, shape index: {}]   ;;  %s1952_s3 = inlined_call_operand.vmem [shape: bf16[64,64], index: 3, kind: input, shape index: {}]   ;;  %s1953_s4 = inlined_call_operand.vmem [shape: f32[1,64], index: 4, kind: input, shape index: {}]   ;;  %s1954_s5 = inlined_call_operand.hbm [shape: bf16[64,784], index: 5, kind: input, shape index: {}]   ;;  %s1955_s6 = inlined_call_operand.vmem [shape: f32[1,784], index: 6, kind: input, shape index: {}]   ;;  %s1956_s7 = inlined_call_operand.hbm [shape: f32[64,784], index: 7, kind: output, shape index: {}]  }
   0x1   :  { %13 = vsyncpa [#allocation4], 0  ;;  %s1620_s24 = smov [#allocation2]   ;;  %s1572_s28 = scalar_lea.hbm %s1954_s5, 3584 }
   0x2   :  { %s29_s25 = sshll.u32 %s1620_s24, 4  ;;  %p1573_p0 = scmp.ne.s32.totalorder %s1954_s5, %s1572_s28  ;;  %s30_s25 = int_to_ptr.vmem [resolvable:$true] %s29_s25 }
   0x3   :  { %p1576_p1 = scmp.lt.u32.totalorder %s1572_s28, %s1954_s5 }
   0x5   :  { %p1578_p2 = pnand %p1576_p1, %p1573_p0 }
   0x7   :  { %1581 = shalt.err (!%p1578_p2)
}
   0x8   :  { %s1582_s10 = scalar_lea.vmem %s30_s25, 3584  ;;  %p1587_p4 = scmp.lt.s32.totalorder %s30_s25, %s30_s25 }
   0x9   :  { %p1583_p3 = scmp.ne.s32.totalorder %s30_s25, %s1582_s10  ;;  %p1588_p5 = scmp.lt.s32.totalorder %s1582_s10, %s1582_s10 }
   0xb   :  { %p1589_p6 = por %p1588_p5, %p1587_p4 }
   0xd   :  { %p1590_p7 = pnand %p1589_p6, %p1583_p3 }
   0xf   :  { %1593 = shalt.err (!%p1590_p7)
}
  0x10   :  { %s1621_s11 = smov 448   ;;  %s1622_s12 = smov 28  }
  0x11   :  { %35 = dma.hbm_to_vmem [thread:$0]  %s1954_s5, 3584, %s30_s25, [#allocation3], %s1621_s11, %s1621_s11, %s1622_s12  }
  0x12   :  { %1616 = dma.done.wait [#allocation3], 3584  }
  0x13   :  { %1617 = vsyncadd [#allocation3], 4294963712  ;;  %v1299_v0 = vld [vmem:[%s1950_s1] sm:$0xff]   ;;  %vm85_vm0 = vcmask 130048   ;;  %v1301_v2 = vld [vmem:[%s1949_s0 + $0x8] sm:$0xff]   ;;  %vm214_vm1 = vcmask 523264  }
  0x14   :  { %v1300_v1 = vld [vmem:[%s1949_s0] sm:$0xff]   ;;  %1250 = vmatprep.subr.bf16.mxu0 %v1299_v0  ;;  %v1302_v3 = vld [vmem:[%s1949_s0 + $0x10] sm:$0xff]   ;;  %v1305_v5 = vld [vmem:[%s1952_s3 + $0x8] sm:$0xff]   ;;  %v1623_v54 = vmov 0  }
  0x15   :  { %1251 = vmatpush3.bf16.msra.mxu0 %v1299_v0  ;;  %1252 = vmatprep.mubr.msk.bf16.mxu0 %vm85_vm0, %v1300_v1  ;;  %v1304_v4 = vld [vmem:[%s1952_s3] sm:$0xff]   ;;  %v1303_v6 = vld [vmem:[%s1949_s0 + $0x18] sm:$0xff]   ;;  %v1306_v7 = vld [vmem:[%s1952_s3 + $0x10] sm:$0xff]  }
  0x16   :  { %1260 = vmatprep.subr.bf16.mxu1 %v1304_v4  ;;  %v1307_v8 = vld [vmem:[%s1952_s3 + $0x18] sm:$0xff]   ;;  %v1310_v10 = vld [vmem:[#allocation2 + $0x4] ss:$28 sps:$4 sm:$0xff]   ;;  %v1313_v11 = vld [vmem:[#allocation2 + $0xc] ss:$28 sps:$4 sm:$0xff]  }
  0x17   :  { %1261 = vmatpush3.bf16.msra.mxu1 %v1304_v4  ;;  %v1308_v9 = vld [vmem:[#allocation2] ss:$28 sps:$4 sm:$0xff]   ;;  %529 = vmatprep.subr.bf16.mxu0 %v1310_v10  ;;  %v1314_v13 = vld [vmem:[#allocation2 + $0x38] ss:$28 sps:$4 sm:$0xff]   ;;  %v1311_v30 = vld [vmem:[#allocation2 + $0x8] ss:$28 sps:$4 sm:$0xff]  }
  0x18   :  { %1253 = vmatmul.mubr.msk.bf16.vlgmr.msra.gmra.mrb[0].mxu0 %vm85_vm0, %v1301_v2  ;;  %1262 = vmatprep.subr.bf16.mxu1 %v1305_v5  ;;  %v1316_v12 = vld [vmem:[#allocation2 + $0x3c] ss:$28 sps:$4 sm:$0xff]   ;;  %v1166_v14 = vld [vmem:[%s1951_s2] ss:$0 sm:$0xff]  ;;  %v1322_v46 = vld [vmem:[#allocation2 + $0x74] ss:$28 sps:$4 sm:$0xff]  }
  0x19   :  { %1256 = vmatprep.mubr.msk.bf16.mxu0 %vm85_vm0, %v1302_v3  ;;  %530 = vmatpush1.bf16.msra.mxu0 %v1308_v9  ;;  %v1319_v33 = vld [vmem:[#allocation2 + $0x44] ss:$28 sps:$4 sm:$0xff]   ;;  %v1325_v47 = vld [vmem:[#allocation2 + $0x7c] ss:$28 sps:$4 sm:$0xff]   ;;  %v1320_v48 = vld [vmem:[#allocation2 + $0x70] ss:$28 sps:$4 sm:$0xff]  }
  0x1a   :  { %531 = vmatprep.subr.bf16.mxu0 %v1316_v12  ;;  %v1317_v41 = vld [vmem:[#allocation2 + $0x40] ss:$28 sps:$4 sm:$0xff]   ;;  %v1323_v49 = vld [vmem:[#allocation2 + $0x78] ss:$28 sps:$4 sm:$0xff]   ;;  %v1328_v50 = vld [vmem:[#allocation2 + $0xac] ss:$28 sps:$4 sm:$0xff]  }
  0x1b   :  { %1263 = vmatpush3.bf16.msra.mxu1 %v1305_v5  ;;  %v1331_v51 = vld [vmem:[#allocation2 + $0xb4] ss:$28 sps:$4 sm:$0xff]   ;;  %v1326_v52 = vld [vmem:[#allocation2 + $0xa8] ss:$28 sps:$4 sm:$0xff]   ;;  %v1176_v57 = vld [vmem:[%s1953_s4] ss:$0 sm:$0xff] }
  0x1c   :  { %1264 = vmatprep.subr.bf16.mxu1 %v1306_v7  ;;  %v1329_v53 = vld [vmem:[#allocation2 + $0xb0] ss:$28 sps:$4 sm:$0xff]   ;;  %v1341_v56 = vld [vmem:[#allocation2 + $0x18] ss:$28 sps:$4 sm:$0xff]  }
  0x1d   :  { %532 = vmatpush1.bf16.msra.mxu0 %v1314_v13  ;;  %v1334_v55 = vld [vmem:[#allocation2 + $0x14] ss:$28 sps:$4 sm:$0xff]   ;;  %v1337_v10 = vld [vmem:[#allocation2 + $0x4c] ss:$28 sps:$4 sm:$0xff]  }
  0x1e   :  { %533 = vmatprep.subr.bf16.mxu0 %v1322_v46 }
  0x1f   :  { %1265 = vmatpush3.bf16.msra.mxu1 %v1306_v7  ;;  %v1332_v7 = vld [vmem:[#allocation2 + $0x10] ss:$28 sps:$4 sm:$0xff]  }
  0x20   :  { %1257 = vmatmul.mubr.msk.bf16.gmra.mrb[4].mxu0 %vm85_vm0, %v1303_v6  ;;  %1266 = vmatprep.subr.bf16.mxu1 %v1307_v8 }
  0x21   :  { %534 = vmatpush1.bf16.msra.mxu0 %v1320_v48  ;;  %561 = vmatprep.mubr.bf16.mxu0 %v1623_v54 }
  0x22   :  { %535 = vmatprep.subr.bf16.mxu0 %v1328_v50 }
  0x23   :  { %1267 = vmatpush3.bf16.msra.mxu1 %v1307_v8 }
  0x24   :  { %602 = vmatprep.subr.bf16.mxu1 %v1313_v11 }
  0x25   :  { %536 = vmatpush1.bf16.msra.mxu0 %v1326_v52 }
  0x26   :  { %675 = vmatprep.subr.bf16.mxu0 %v1334_v55 }
  0xeb   :  { %v1254_v15 = vpop.f32.mrb[0].mxu0 }
  0xec   :  { %v141_v16 = vadd.f32 %v1254_v15, %v1166_v14  ;;  %v132_v17 = vpop.f32.mrb[1].mxu0  ;;  %v1342_v15 = vld [vmem:[#allocation2 + $0x50] ss:$28 sps:$4 sm:$0xff]  }
  0xed   :  { %v133_v18 = vadd.f32 %v1166_v14, %v132_v17  ;;  %v1255_v19 = vpop.f32.mrb[2].mxu0 }
  0xee   :  { %v144_v20 = vadd.f32 %v1255_v19, %v1166_v14  ;;  %v135_v21 = vpop.f32.mrb[3].mxu0  ;;  %v165_v23 = vmax.f32 %v141_v16, 0.0  ;;  %v1335_v19 = vld [vmem:[#allocation2 + $0x48] ss:$28 sps:$4 sm:$0xff]  }
  0xef   :  { %v136_v22 = vadd.f32 %v1166_v14, %v135_v21  ;;  %v163_v25 = vmax.f32 %v133_v18, 0.0 }
  0xf0   :  { %v166_v24 = vmax.f32 %v144_v20, 0.0 }
  0xf1   :  { %v164_v26 = vmax.f32 %v136_v22, 0.0  ;;  %v1340_v22 = vld [vmem:[#allocation2 + $0x84] ss:$28 sps:$4 sm:$0xff]  }
  0xf2   :  { %v172_v27 = vpack.c.bf16 %v166_v24, %v165_v23 }
  0xf3   :  { %v1258_v28 = vpop.f32.mrb[4].mxu0  ;;  %v171_v29 = vpack.c.bf16 %v164_v26, %v163_v25 }
  0xf4   :  { %v157_v31 = vadd.f32 %v1258_v28, %v1166_v14  ;;  %v148_v32 = vpop.f32.mrb[5].mxu0  ;;  %v1346_v28 = vld [vmem:[#allocation2 + $0x88] ss:$28 sps:$4 sm:$0xff]  }
  0xf5   :  { %v149_v34 = vadd.f32 %v1166_v14, %v148_v32  ;;  %1268 = vmatprep.mubr.msk.bf16.mxu1 %vm214_vm1, %v171_v29  ;;  %v1259_v35 = vpop.f32.mrb[6].mxu0  ;;  %v1345_v29 = vld [vmem:[#allocation2 + $0xbc] ss:$28 sps:$4 sm:$0xff]   ;;  %v338_v32 = vlaneseq }
  0xf6   :  { %v169_v36 = vmax.f32 %v157_v31, 0.0  ;;  %v160_v37 = vadd.f32 %v1259_v35, %v1166_v14  ;;  %1269 = vmatmul.mubr.msk.bf16.vlgmr.msra.gmra.mrb[0].mxu1 %vm214_vm1, %v172_v27  ;;  %v151_v38 = vpop.f32.mrb[7].mxu0  ;;  %v1338_v27 = vld [vmem:[#allocation2 + $0x80] ss:$28 sps:$4 sm:$0xff]   ;;  %v1343_v31 = vld [vmem:[#allocation2 + $0xb8] ss:$28 sps:$4 sm:$0xff]  }
  0xf7   :  { %v167_v39 = vmax.f32 %v149_v34, 0.0  ;;  %v152_v40 = vadd.f32 %v1166_v14, %v151_v38  ;;  %603 = vmatpush1.bf16.msra.mxu1 %v1311_v30  ;;  %v1347_v30 = vld [vmem:[#allocation2 + $0xc0] ss:$28 sps:$4 sm:$0xff]  }
  0xf8   :  { %v170_v42 = vmax.f32 %v160_v37, 0.0  ;;  %604 = vmatprep.subr.bf16.mxu1 %v1319_v33  ;;  %v1748_v33 = vshrl.u32 %v338_v32, 7 }
  0xf9   :  { %v168_v43 = vmax.f32 %v152_v40, 0.0 }
  0xfa   :  { %v174_v44 = vpack.c.bf16 %v170_v42, %v169_v36  ;;  %v340_v34 = vsub.s32 0, %v1748_v33  ;;  %v348_v35 = vsub.s32 2, %v1748_v33  ;;  %v1755_v36 = vld [vmem:[%s1955_s6] sm:$0x7f]  ;;  %v344_v37 = vsub.s32 1, %v1748_v33  ;;  %s1624_s6 = smov [#allocation5]  }
  0xfb   :  { %v173_v45 = vpack.c.bf16 %v168_v43, %v167_v39  ;;  %605 = vmatpush1.bf16.msra.mxu1 %v1317_v41  ;;  %v352_v38 = vsub.s32 3, %v1748_v33  ;;  %s1154_s10 = sshll.u32 %s1624_s6, 4  ;;  %s1155_s10 = int_to_ptr.vmem [resolvable:$true] %s1154_s10 }
  0xfc   :  { %606 = vmatprep.subr.bf16.mxu1 %v1325_v47  ;;  %v1760_v39 = vrot.slane %v1755_v36, %v340_v34  ;;  %v1763_v40 = vrot.slane %v1755_v36, %v348_v35  ;;  %v1766_v41 = vrot.slane %v1755_v36, %v344_v37  ;;  %s1594_s11 = scalar_lea.vmem %s1155_s10, 7168  ;;  %p1599_p9 = scmp.lt.s32.totalorder %s1155_s10, %s1155_s10 }
  0xfd   :  { %1272 = vmatprep.mubr.msk.bf16.mxu1 %vm214_vm1, %v173_v45  ;;  %v1769_v42 = vrot.slane %v1755_v36, %v352_v38  ;;  %p1595_p8 = scmp.ne.s32.totalorder %s1155_s10, %s1594_s11  ;;  %p1600_p10 = scmp.lt.s32.totalorder %s1594_s11, %s1594_s11 }
  0xfe   :  { %1273 = vmatmul.mubr.msk.bf16.gmra.mrb[4].mxu1 %vm214_vm1, %v174_v44 }
  0xff   :  { %607 = vmatpush1.bf16.msra.mxu1 %v1323_v49  ;;  %634 = vmatprep.mubr.bf16.mxu1 %v1623_v54  ;;  %p1601_p11 = por %p1600_p10, %p1599_p9 }
 0x100   :  { %608 = vmatprep.subr.bf16.mxu1 %v1331_v51 }
 0x101   :  { %p1602_p12 = pnand %p1601_p11, %p1595_p8 }
 0x103   :  { %609 = vmatpush1.bf16.msra.mxu1 %v1329_v53 }
 0x104   :  { %1276 = vmatprep.subr.bf16.mxu1 %v1341_v56 }
 0x1c9   :  { %v1270_v58 = vpop.f32.mrb[0].mxu1 }
 0x1ca   :  { %v270_v59 = vadd.f32 %v1270_v58, %v1176_v57  ;;  %v261_v60 = vpop.f32.mrb[1].mxu1 }
 0x1cb   :  { %v262_v61 = vadd.f32 %v1176_v57, %v261_v60  ;;  %v1271_v62 = vpop.f32.mrb[2].mxu1 }
 0x1cc   :  { %v273_v63 = vadd.f32 %v1271_v62, %v1176_v57  ;;  %v264_v0 = vpop.f32.mrb[3].mxu1  ;;  %v294_v2 = vmax.f32 %v270_v59, 0.0 }
 0x1cd   :  { %v265_v1 = vadd.f32 %v1176_v57, %v264_v0  ;;  %v292_v4 = vmax.f32 %v262_v61, 0.0 }
 0x1ce   :  { %v295_v3 = vmax.f32 %v273_v63, 0.0 }
 0x1cf   :  { %v293_v5 = vmax.f32 %v265_v1, 0.0 }
 0x1d0   :  { %v301_v6 = vpack.c.bf16 %v295_v3, %v294_v2 }
 0x1d1   :  { %v300_v8 = vpack.c.bf16 %v293_v5, %v292_v4  ;;  %v1274_v9 = vpop.f32.mrb[4].mxu1 }
 0x1d2   :  { %v286_v11 = vadd.f32 %v1274_v9, %v1176_v57  ;;  %v277_v12 = vpop.f32.mrb[5].mxu1 }
 0x1d3   :  { %v278_v13 = vadd.f32 %v1176_v57, %v277_v12  ;;  %1213 = vmatmul.mubr.msk.bf16.vlgmr.msra.gmra.mrb[8].mxu0 %vm214_vm1, %v300_v8  ;;  %1217 = vmatmul.mubr.msk.bf16.vlgmr.msra.gmra.mrb[8].mxu1 %vm214_vm1, %v300_v8  ;;  %v1275_v14 = vpop.f32.mrb[6].mxu1 }
 0x1d4   :  { %v298_v16 = vmax.f32 %v286_v11, 0.0  ;;  %676 = vmatpush1.bf16.msra.mxu0 %v1332_v7  ;;  %v289_v17 = vadd.f32 %v1275_v14, %v1176_v57  ;;  %v280_v18 = vpop.f32.mrb[7].mxu1  ;;  %571 = vmatprep.mubr.bf16.mxu0 %v1623_v54 }
 0x1d5   :  { %v296_v20 = vmax.f32 %v278_v13, 0.0  ;;  %v281_v21 = vadd.f32 %v1176_v57, %v280_v18  ;;  %644 = vmatprep.mubr.bf16.mxu1 %v1623_v54  ;;  %677 = vmatprep.subr.bf16.mxu0 %v1337_v10 }
 0x1d6   :  { %v299_v23 = vmax.f32 %v289_v17, 0.0  ;;  %1277 = vmatpush3.bf16.msra.mxu1 %v1341_v56 }
 0x1d7   :  { %v297_v24 = vmax.f32 %v281_v21, 0.0  ;;  %1278 = vmatprep.subr.bf16.mxu1 %v1342_v15 }
 0x1d8   :  { %v303_v25 = vpack.c.bf16 %v299_v23, %v298_v16  ;;  %678 = vmatpush1.bf16.msra.mxu0 %v1335_v19 }
 0x1d9   :  { %v302_v26 = vpack.c.bf16 %v297_v24, %v296_v20  ;;  %679 = vmatprep.subr.bf16.mxu0 %v1340_v22 }
 0x1da   :  { %1279 = vmatpush3.bf16.msra.mxu1 %v1342_v15 }
 0x1db   :  { %1214 = vmatmul.mubr.msk.bf16.gmra.mrb[12].mxu0 %vm214_vm1, %v301_v6  ;;  %1218 = vmatmul.mubr.msk.bf16.gmra.mrb[12].mxu1 %vm214_vm1, %v301_v6 }
 0x1dc   :  { %581 = vmatprep.mubr.bf16.mxu0 %v1623_v54  ;;  %654 = vmatprep.mubr.bf16.mxu1 %v1623_v54 }
 0x1dd   :  { %680 = vmatpush1.bf16.msra.mxu0 %v1338_v27  ;;  %1280 = vmatprep.subr.bf16.mxu1 %v1346_v28 }
 0x1de   :  { %681 = vmatprep.subr.bf16.mxu0 %v1345_v29  ;;  %1281 = vmatpush3.bf16.msra.mxu1 %v1346_v28 }
 0x1df   :  { %1282 = vmatprep.subr.bf16.mxu1 %v1347_v30 }
 0x1e1   :  { %682 = vmatpush1.bf16.msra.mxu0 %v1343_v31 }
 0x1e2   :  { %1283 = vmatpush3.bf16.msra.mxu1 %v1347_v30 }
 0x1e3   :  { %1215 = vmatmul.mubr.msk.bf16.gmra.mrb[16].mxu0 %vm214_vm1, %v302_v26  ;;  %1219 = vmatmul.mubr.msk.bf16.gmra.mrb[16].mxu1 %vm214_vm1, %v302_v26 }
 0x1e4   :  { %591 = vmatprep.mubr.bf16.mxu0 %v1623_v54  ;;  %664 = vmatprep.mubr.bf16.mxu1 %v1623_v54 }
 0x1eb   :  { %1216 = vmatmul.mubr.msk.bf16.gmra.mrb[20].mxu0 %vm214_vm1, %v303_v25  ;;  %1220 = vmatmul.mubr.msk.bf16.gmra.mrb[20].mxu1 %vm214_vm1, %v303_v25 }
 0x1ec   :  { %1284 = vmatprep.mubr.msk.bf16.mxu1 %vm214_vm1, %v300_v8  ;;  %707 = vmatprep.mubr.bf16.mxu0 %v1623_v54 }
 0x1f3   :  { %1221 = vmatmul.mubr.msk.bf16.vlgmr.msra.gmra.mrb[24].mxu0 %vm214_vm1, %v300_v8  ;;  %1285 = vmatmul.mubr.msk.bf16.vlgmr.msra.gmra.mrb[24].mxu1 %vm214_vm1, %v301_v6 }
 0x1f4   :  { %1288 = vmatprep.mubr.msk.bf16.mxu1 %vm214_vm1, %v302_v26  ;;  %717 = vmatprep.mubr.bf16.mxu0 %v1623_v54 }
 0x1fb   :  { %1222 = vmatmul.mubr.msk.bf16.gmra.mrb[28].mxu0 %vm214_vm1, %v301_v6  ;;  %1289 = vmatmul.mubr.msk.bf16.gmra.mrb[28].mxu1 %vm214_vm1, %v303_v25 }
 0x1fc   :  { %727 = vmatprep.mubr.bf16.mxu0 %v1623_v54 }
 0x203   :  { %1223 = vmatmul.mubr.msk.bf16.gmra.mrb[32].mxu0 %vm214_vm1, %v302_v26 }
 0x204   :  { %737 = vmatprep.mubr.bf16.mxu0 %v1623_v54 }
 0x20b   :  { %1224 = vmatmul.mubr.msk.bf16.gmra.mrb[36].mxu0 %vm214_vm1, %v303_v25 }
 0x2a6   :  { %v563_v43 = vpop.f32.mrb[8].mxu0  ;;  %v636_v44 = vpop.f32.mrb[8].mxu1 }
 0x2a7   :  { %v564_v45 = vadd.f32 %v563_v43, %v1760_v39  ;;  %v637_v46 = vadd.f32 %v636_v44, %v1763_v40  ;;  %v565_v47 = vpop.f32.mrb[9].mxu0  ;;  %v638_v48 = vpop.f32.mrb[9].mxu1 }
 0x2a8   :  { %v566_v49 = vadd.f32 %v565_v47, %v1766_v41  ;;  %v639_v50 = vadd.f32 %v638_v48, %v1769_v42  ;;  %v567_v51 = vpop.f32.mrb[10].mxu0  ;;  %v640_v52 = vpop.f32.mrb[10].mxu1 }
 0x2a9   :  { %v813_v53 = vsub.f32 0.0, %v564_v45  ;;  %v815_v54 = vsub.f32 0.0, %v637_v46  ;;  %v568_v55 = vadd.f32 %v567_v51, %v1760_v39  ;;  %v641_v56 = vadd.f32 %v640_v52, %v1763_v40  ;;  %v569_v57 = vpop.f32.mrb[11].mxu0  ;;  %v642_v58 = vpop.f32.mrb[11].mxu1 }
 0x2aa   :  { %v814_v59 = vsub.f32 0.0, %v566_v49  ;;  %v816_v60 = vsub.f32 0.0, %v639_v50  ;;  %v570_v61 = vadd.f32 %v569_v57, %v1766_v41  ;;  %v643_v62 = vadd.f32 %v642_v58, %v1769_v42 }
 0x2ab   :  { %v869_v63 = vmul.f32 1.442695, %v813_v53  ;;  %v873_v0 = vmul.f32 1.442695, %v815_v54  ;;  %v820_v1 = vsub.f32 0.0, %v568_v55  ;;  %v822_v2 = vsub.f32 0.0, %v641_v56 }
 0x2ac   :  { %v871_v3 = vmul.f32 1.442695, %v814_v59  ;;  %v875_v4 = vmul.f32 1.442695, %v816_v60  ;;  %v821_v5 = vsub.f32 0.0, %v570_v61  ;;  %v823_v6 = vsub.f32 0.0, %v643_v62 }
 0x2ad   :  { %1348 = vpow2.f32 %v869_v63  ;;  %v883_v7 = vmul.f32 1.442695, %v820_v1  ;;  %v887_v8 = vmul.f32 1.442695, %v822_v2 }
 0x2ae   :  { %1350 = vpow2.f32 %v873_v0  ;;  %v573_v9 = vpop.f32.mrb[12].mxu0  ;;  %v646_v10 = vpop.f32.mrb[12].mxu1  ;;  %v885_v11 = vmul.f32 1.442695, %v821_v5  ;;  %v889_v16 = vmul.f32 1.442695, %v823_v6 }
 0x2af   :  { %1352 = vpow2.f32 %v871_v3  ;;  %v574_v12 = vadd.f32 %v573_v9, %v1760_v39  ;;  %v647_v13 = vadd.f32 %v646_v10, %v1763_v40  ;;  %v575_v14 = vpop.f32.mrb[13].mxu0  ;;  %v648_v15 = vpop.f32.mrb[13].mxu1 }
 0x2b0   :  { %1354 = vpow2.f32 %v875_v4  ;;  %v576_v17 = vadd.f32 %v575_v14, %v1766_v41  ;;  %v649_v18 = vadd.f32 %v648_v15, %v1769_v42  ;;  %v577_v19 = vpop.f32.mrb[14].mxu0  ;;  %v650_v20 = vpop.f32.mrb[14].mxu1 }
 0x2b1   :  { %1356 = vpow2.f32 %v883_v7  ;;  %v827_v21 = vsub.f32 0.0, %v574_v12  ;;  %v829_v22 = vsub.f32 0.0, %v647_v13  ;;  %v578_v23 = vadd.f32 %v577_v19, %v1760_v39  ;;  %v579_v24 = vpop.f32.mrb[15].mxu0  ;;  %v652_v25 = vpop.f32.mrb[15].mxu1 }
 0x2b2   :  { %1358 = vpow2.f32 %v887_v8  ;;  %v828_v26 = vsub.f32 0.0, %v576_v17  ;;  %v830_v27 = vsub.f32 0.0, %v649_v18  ;;  %v651_v43 = vadd.f32 %v650_v20, %v1763_v40 }
 0x2b3   :  { %1360 = vpow2.f32 %v885_v11  ;;  %v897_v28 = vmul.f32 1.442695, %v827_v21  ;;  %v901_v29 = vmul.f32 1.442695, %v829_v22  ;;  %v834_v30 = vsub.f32 0.0, %v578_v23 }
 0x2b4   :  { %1362 = vpow2.f32 %v889_v16  ;;  %v899_v31 = vmul.f32 1.442695, %v828_v26  ;;  %v903_v32 = vmul.f32 1.442695, %v830_v27  ;;  %v580_v52 = vadd.f32 %v579_v24, %v1766_v41 }
 0x2b5   :  { %1364 = vpow2.f32 %v897_v28  ;;  %v911_v34 = vmul.f32 1.442695, %v834_v30  ;;  %v836_v59 = vsub.f32 0.0, %v651_v43  ;;  %v653_v62 = vadd.f32 %v652_v25, %v1769_v42 }
 0x2b6   :  { %1366 = vpow2.f32 %v901_v29  ;;  %v583_v35 = vpop.f32.mrb[16].mxu0  ;;  %v656_v37 = vpop.f32.mrb[16].mxu1  ;;  %v835_v1 = vsub.f32 0.0, %v580_v52 }
 0x2b7   :  { %v1349_v38 = vpop.eup %1348  ;;  %1368 = vpow2.f32 %v899_v31  ;;  %v585_v44 = vpop.f32.mrb[17].mxu0  ;;  %v584_v4 = vadd.f32 %v583_v35, %v1760_v39  ;;  %v915_v9 = vmul.f32 1.442695, %v836_v59  ;;  %v657_v10 = vadd.f32 %v656_v37, %v1763_v40 }
 0x2b8   :  { %v658_v45 = vpop.f32.mrb[17].mxu1  ;;  %v1351_v46 = vpop.eup %1350  ;;  %v981_v47 = vadd.f32 1.0, %v1349_v38  ;;  %1370 = vpow2.f32 %v903_v32  ;;  %v837_v15 = vsub.f32 0.0, %v653_v62  ;;  %v586_v16 = vadd.f32 %v585_v44, %v1766_v41 }
 0x2b9   :  { %v587_v48 = vpop.f32.mrb[18].mxu0  ;;  %v660_v49 = vpop.f32.mrb[18].mxu1  ;;  %v983_v51 = vadd.f32 1.0, %v1351_v46  ;;  %1372 = vpow2.f32 %v911_v34  ;;  %v913_v21 = vmul.f32 1.442695, %v835_v1  ;;  %v659_v22 = vadd.f32 %v658_v45, %v1769_v42 }
 0x2ba   :  { %v1353_v50 = vpop.eup %1352  ;;  %v589_v53 = vpop.f32.mrb[19].mxu0  ;;  %1374 = vrcp.f32 %v981_v47  ;;  %v841_v27 = vsub.f32 0.0, %v584_v4  ;;  %v588_v28 = vadd.f32 %v587_v48, %v1760_v39  ;;  %v843_v31 = vsub.f32 0.0, %v657_v10 }
 0x2bb   :  { %v1355_v54 = vpop.eup %1354  ;;  %v982_v55 = vadd.f32 1.0, %v1353_v50  ;;  %v662_v56 = vpop.f32.mrb[19].mxu1  ;;  %1376 = vrcp.f32 %v983_v51  ;;  %v661_v32 = vadd.f32 %v660_v49, %v1763_v40  ;;  %v842_v37 = vsub.f32 0.0, %v586_v16 }
 0x2bc   :  { %v1357_v57 = vpop.eup %1356  ;;  %v984_v58 = vadd.f32 1.0, %v1355_v54  ;;  %v590_v38 = vadd.f32 %v589_v53, %v1766_v41  ;;  %v917_v44 = vmul.f32 1.442695, %v837_v15  ;;  %v844_v45 = vsub.f32 0.0, %v659_v22 }
 0x2bd   :  { %v1359_v60 = vpop.eup %1358  ;;  %1378 = vrcp.f32 %v982_v55  ;;  %v988_v61 = vadd.f32 1.0, %v1357_v57  ;;  %v663_v46 = vadd.f32 %v662_v56, %v1769_v42  ;;  %v925_v48 = vmul.f32 1.442695, %v841_v27 }
 0x2be   :  { %v1361_v63 = vpop.eup %1360  ;;  %1380 = vrcp.f32 %v984_v58  ;;  %v990_v0 = vadd.f32 1.0, %v1359_v60  ;;  %v593_v5 = vpop.f32.mrb[20].mxu0  ;;  %v848_v50 = vsub.f32 0.0, %v588_v28  ;;  %v929_v53 = vmul.f32 1.442695, %v843_v31 }
 0x2bf   :  { %v1363_v2 = vpop.eup %1362  ;;  %1382 = vrcp.f32 %v988_v61  ;;  %v989_v3 = vadd.f32 1.0, %v1361_v63  ;;  %v666_v6 = vpop.f32.mrb[20].mxu1  ;;  %v594_v49 = vadd.f32 %v593_v5, %v1760_v39  ;;  %v850_v55 = vsub.f32 0.0, %v661_v32 }
 0x2c0   :  { %v1365_v7 = vpop.eup %1364  ;;  %1384 = vrcp.f32 %v990_v0  ;;  %v991_v8 = vadd.f32 1.0, %v1363_v2  ;;  %v1789_v11 = vpop.f32.mrb[21].mxu0  ;;  %v667_v57 = vadd.f32 %v666_v6, %v1763_v40  ;;  %v927_v60 = vmul.f32 1.442695, %v842_v37 }
 0x2c1   :  { %v1791_v12 = vpop.f32.mrb[21].mxu1  ;;  %v1367_v13 = vpop.eup %1366  ;;  %1386 = vrcp.f32 %v989_v3  ;;  %v995_v14 = vadd.f32 1.0, %v1365_v7  ;;  %v849_v61 = vsub.f32 0.0, %v590_v38  ;;  %v931_v0 = vmul.f32 1.442695, %v844_v45 }
 0x2c2   :  { %v1794_v17 = vpop.f32.mrb[22].mxu0  ;;  %v1796_v18 = vpop.f32.mrb[22].mxu1  ;;  %1388 = vrcp.f32 %v991_v8  ;;  %v997_v20 = vadd.f32 1.0, %v1367_v13  ;;  %v851_v1 = vsub.f32 0.0, %v663_v46  ;;  %v939_v4 = vmul.f32 1.442695, %v848_v50 }
 0x2c3   :  { %v1369_v19 = vpop.eup %1368  ;;  %v1799_v23 = vpop.f32.mrb[23].mxu0  ;;  %1390 = vrcp.f32 %v995_v14  ;;  %v855_v5 = vsub.f32 0.0, %v594_v49  ;;  %v857_v10 = vsub.f32 0.0, %v667_v57  ;;  %v941_v14 = vmul.f32 1.442695, %v849_v61 }
 0x2c4   :  { %v1801_v24 = vpop.f32.mrb[23].mxu1  ;;  %v1371_v25 = vpop.eup %1370  ;;  %v996_v26 = vadd.f32 1.0, %v1369_v19  ;;  %1392 = vrcp.f32 %v997_v20  ;;  %v945_v16 = vmul.f32 1.442695, %v851_v1  ;;  %v596_v37 = vadd.f32 %v1789_v11, %v1766_v41 }
 0x2c5   :  { %v1373_v29 = vpop.eup %1372  ;;  %v998_v30 = vadd.f32 1.0, %v1371_v25  ;;  %v953_v20 = vmul.f32 1.442695, %v855_v5  ;;  %v957_v25 = vmul.f32 1.442695, %v857_v10  ;;  %v356_v38 = vsub.s32 4, %v1748_v33 }
 0x2c6   :  { %v1375_v34 = vpop.eup %1374  ;;  %1394 = vrcp.f32 %v996_v26  ;;  %v1002_v35 = vadd.f32 1.0, %v1373_v29  ;;  %v1808_v51 = vpop.f32.mrb[24].mxu0 }
 0x2c7   :  { %v1377_v43 = vpop.eup %1376  ;;  %1093 = vst [vmem:[#allocation5] sm:$0xff] %v1375_v34  ;;  %1396 = vrcp.f32 %v998_v30  ;;  %v1810_v52 = vpop.f32.mrb[24].mxu1  ;;  %v1851_v61 = vrot.slane %v1755_v36, %v356_v38 }
 0x2c8   :  { %v1379_v47 = vpop.eup %1378  ;;  %1095 = vst [vmem:[#allocation5 + $0x10] sm:$0xff] %v1377_v43  ;;  %1398 = vrcp.f32 %v1002_v35  ;;  %v1813_v58 = vpop.f32.mrb[25].mxu0 }
 0x2c9   :  { %v1381_v54 = vpop.eup %1380  ;;  %1094 = vst [vmem:[#allocation5 + $0x8] sm:$0xff] %v1379_v47  ;;  %1400 = vpow2.f32 %v915_v9  ;;  %v1815_v56 = vpop.f32.mrb[25].mxu1  ;;  %v943_v9 = vmul.f32 1.442695, %v850_v55  ;;  %v669_v47 = vadd.f32 %v1791_v12, %v1769_v42  ;;  %v598_v55 = vadd.f32 %v1794_v17, %v1760_v39 }
 0x2ca   :  { %v1383_v59 = vpop.eup %1382  ;;  %1096 = vst [vmem:[#allocation5 + $0x18] sm:$0xff] %v1381_v54  ;;  %1402 = vpow2.f32 %v913_v21  ;;  %v1817_v62 = vpop.f32.mrb[26].mxu0  ;;  %v360_v54 = vsub.s32 5, %v1748_v33  ;;  %v671_v17 = vadd.f32 %v1796_v18, %v1763_v40  ;;  %v673_v40 = vadd.f32 %v1801_v24, %v1769_v42 }
 0x2cb   :  { %v1385_v63 = vpop.eup %1384  ;;  %1100 = vst [vmem:[#allocation5 + $0x38] sm:$0xff] %v1383_v59  ;;  %1404 = vpow2.f32 %v917_v44  ;;  %v1819_v2 = vpop.f32.mrb[26].mxu1  ;;  %v858_v1 = vsub.f32 0.0, %v669_v47 }
 0x2cc   :  { %v1387_v3 = vpop.eup %1386  ;;  %1102 = vst [vmem:[#allocation5 + $0x48] sm:$0xff] %v1385_v63  ;;  %1406 = vpow2.f32 %v925_v48  ;;  %v1821_v6 = vpop.f32.mrb[27].mxu0  ;;  %v364_v48 = vsub.s32 6, %v1748_v33  ;;  %v1863_v5 = vrot.slane %v1755_v36, %v360_v54 }
 0x2cd   :  { %v1823_v7 = vpop.f32.mrb[27].mxu1  ;;  %v1389_v8 = vpop.eup %1388  ;;  %1101 = vst [vmem:[#allocation5 + $0x40] sm:$0xff] %v1387_v3  ;;  %1408 = vpow2.f32 %v929_v53 }
 0x2ce   :  { %v1391_v13 = vpop.eup %1390  ;;  %1103 = vst [vmem:[#allocation5 + $0x50] sm:$0xff] %v1389_v8  ;;  %1410 = vpow2.f32 %v927_v60  ;;  %v1825_v21 = vpop.f32.mrb[28].mxu0  ;;  %v856_v60 = vsub.f32 0.0, %v596_v37  ;;  %v1856_v33 = vrot.slane %v1755_v36, %v364_v48  ;;  %v712_v42 = vadd.f32 %v1813_v58, %v1863_v5 }
 0x2cf   :  { %v1393_v15 = vpop.eup %1392  ;;  %1107 = vst [vmem:[#allocation5 + $0x70] sm:$0xff] %v1391_v13  ;;  %1412 = vpow2.f32 %v931_v0  ;;  %v1827_v26 = vpop.f32.mrb[28].mxu1  ;;  %v862_v13 = vsub.f32 0.0, %v598_v55 }
 0x2d0   :  { %v1395_v19 = vpop.eup %1394  ;;  %1109 = vst [vmem:[#allocation5 + $0x80] sm:$0xff] %v1393_v15  ;;  %1414 = vpow2.f32 %v939_v4  ;;  %v1829_v28 = vpop.f32.mrb[29].mxu0 }
 0x2d1   :  { %v1397_v22 = vpop.eup %1396  ;;  %1108 = vst [vmem:[#allocation5 + $0x78] sm:$0xff] %v1395_v19  ;;  %1416 = vpow2.f32 %v943_v9  ;;  %v1831_v29 = vpop.f32.mrb[29].mxu1 }
 0x2d2   :  { %v1399_v27 = vpop.eup %1398  ;;  %1110 = vst [vmem:[#allocation5 + $0x88] sm:$0xff] %v1397_v22  ;;  %1418 = vpow2.f32 %v941_v14  ;;  %v1833_v31 = vpop.f32.mrb[30].mxu0  ;;  %v600_v14 = vadd.f32 %v1799_v23, %v1766_v41  ;;  %v959_v22 = vmul.f32 1.442695, %v858_v1  ;;  %v864_v41 = vsub.f32 0.0, %v671_v17 }
 0x2d3   :  { %v1401_v30 = vpop.eup %1400  ;;  %1114 = vst [vmem:[#allocation5 + $0xa8] sm:$0xff] %v1399_v27  ;;  %1420 = vpow2.f32 %v945_v16  ;;  %v1835_v32 = vpop.f32.mrb[30].mxu1  ;;  %v791_v23 = vadd.f32 %v1810_v52, %v1856_v33  ;;  %v967_v52 = vmul.f32 1.442695, %v862_v13 }
 0x2d4   :  { %v1403_v34 = vpop.eup %1402  ;;  %v1004_v35 = vadd.f32 1.0, %v1401_v30  ;;  %1422 = vpow2.f32 %v953_v20  ;;  %v1840_v43 = vpop.f32.mrb[31].mxu0  ;;  %v955_v20 = vmul.f32 1.442695, %v856_v60  ;;  %v863_v37 = vsub.f32 0.0, %v600_v14 }
 0x2d5   :  { %v1842_v44 = vpop.f32.mrb[31].mxu1  ;;  %v1405_v45 = vpop.eup %1404  ;;  %v1003_v46 = vadd.f32 1.0, %v1403_v34  ;;  %1424 = vpow2.f32 %v957_v25  ;;  %v710_v25 = vadd.f32 %v1808_v51, %v1851_v61  ;;  %v783_v51 = vadd.f32 %v1815_v56, %v1856_v33 }
 0x2d6   :  { %v1407_v50 = vpop.eup %1406  ;;  %1426 = vrcp.f32 %v1004_v35  ;;  %v1005_v49 = vadd.f32 1.0, %v1405_v45  ;;  %v1853_v12 = vpop.f32.mrb[32].mxu0  ;;  %v865_v45 = vsub.f32 0.0, %v673_v40  ;;  %v971_v54 = vmul.f32 1.442695, %v864_v41 }
 0x2d7   :  { %v1409_v11 = vpop.eup %1408  ;;  %1428 = vrcp.f32 %v1003_v46  ;;  %v1009_v53 = vadd.f32 1.0, %v1407_v50  ;;  %v1858_v3 = vpop.f32.mrb[33].mxu0  ;;  %v817_v48 = vsub.f32 0.0, %v710_v25  ;;  %v714_v50 = vadd.f32 %v1817_v62, %v1851_v61 }
 0x2d8   :  { %v1411_v57 = vpop.eup %1410  ;;  %1430 = vrcp.f32 %v1005_v49  ;;  %v1011_v59 = vadd.f32 1.0, %v1409_v11  ;;  %v1865_v8 = vpop.f32.mrb[34].mxu0  ;;  %v833_v11 = vsub.f32 0.0, %v791_v23  ;;  %v794_v56 = vadd.f32 %v1819_v2, %v1856_v33 }
 0x2d9   :  { %v1413_v63 = vpop.eup %1412  ;;  %1432 = vrcp.f32 %v1009_v53  ;;  %v1010_v0 = vadd.f32 1.0, %v1411_v57  ;;  %v1869_v15 = vpop.f32.mrb[35].mxu0  ;;  %v969_v57 = vmul.f32 1.442695, %v863_v37  ;;  %v716_v62 = vadd.f32 %v1821_v6, %v1863_v5 }
 0x2da   :  { %v1415_v4 = vpop.eup %1414  ;;  %1434 = vrcp.f32 %v1011_v59  ;;  %v1012_v39 = vadd.f32 1.0, %v1413_v63  ;;  %v818_v59 = vsub.f32 0.0, %v712_v42  ;;  %v819_v1 = vsub.f32 0.0, %v783_v51 }
 0x2db   :  { %v1417_v9 = vpop.eup %1416  ;;  %1436 = vrcp.f32 %v1010_v0  ;;  %v1016_v10 = vadd.f32 1.0, %v1415_v4  ;;  %v973_v0 = vmul.f32 1.442695, %v865_v45  ;;  %v877_v2 = vmul.f32 1.442695, %v817_v48 }
 0x2dc   :  { %v1419_v16 = vpop.eup %1418  ;;  %1438 = vrcp.f32 %v1012_v39  ;;  %v1018_v19 = vadd.f32 1.0, %v1417_v9  ;;  %v824_v39 = vsub.f32 0.0, %v714_v50  ;;  %v909_v9 = vmul.f32 1.442695, %v833_v11 }
 0x2dd   :  { %v1421_v36 = vpop.eup %1420  ;;  %1440 = vrcp.f32 %v1016_v10  ;;  %v1017_v18 = vadd.f32 1.0, %v1419_v16  ;;  %v840_v10 = vsub.f32 0.0, %v794_v56  ;;  %v879_v6 = vmul.f32 1.442695, %v818_v59 }
 0x2de   :  { %v1423_v27 = vpop.eup %1422  ;;  %1442 = vrcp.f32 %v1018_v19  ;;  %v1019_v30 = vadd.f32 1.0, %v1421_v36  ;;  %v1881_v46 = vpop.f32.mrb[36].mxu0  ;;  %v825_v14 = vsub.f32 0.0, %v716_v62  ;;  %v881_v19 = vmul.f32 1.442695, %v819_v1 }
 0x2df   :  { %v1425_v34 = vpop.eup %1424  ;;  %1444 = vrcp.f32 %v1017_v18  ;;  %v1023_v35 = vadd.f32 1.0, %v1423_v27  ;;  %v1885_v49 = vpop.f32.mrb[37].mxu0  ;;  %v891_v40 = vmul.f32 1.442695, %v824_v39  ;;  %v923_v18 = vmul.f32 1.442695, %v840_v10 }
 0x2e0   :  { %v1427_v24 = vpop.eup %1426  ;;  %1446 = vrcp.f32 %v1019_v30  ;;  %v1025_v38 = vadd.f32 1.0, %v1425_v34  ;;  %v1889_v53 = vpop.f32.mrb[38].mxu0  ;;  %v893_v25 = vmul.f32 1.442695, %v825_v14  ;;  %v786_v41 = vadd.f32 %v1823_v7, %v1856_v33 }
 0x2e1   :  { %v1429_v47 = vpop.eup %1428  ;;  %1116 = vst [vmem:[#allocation5 + $0xb8] sm:$0xff] %v1427_v24  ;;  %1448 = vrcp.f32 %v1023_v35  ;;  %v1893_v60 = vpop.f32.mrb[39].mxu0  ;;  %v807_v7 = vadd.f32 %v1827_v26, %v1856_v33  ;;  %v724_v1 = vadd.f32 %v1833_v31, %v1851_v61  ;;  %v810_v39 = vadd.f32 %v1835_v32, %v1856_v33 }
 0x2e2   :  { %v1431_v58 = vpop.eup %1430  ;;  %1115 = vst [vmem:[#allocation5 + $0xb0] sm:$0xff] %v1429_v47  ;;  %1450 = vrcp.f32 %v1025_v38  ;;  %v826_v51 = vsub.f32 0.0, %v786_v41  ;;  %v720_v47 = vadd.f32 %v1825_v21, %v1851_v61  ;;  %v726_v10 = vadd.f32 %v1840_v43, %v1863_v5 }
 0x2e3   :  { %v1433_v55 = vpop.eup %1432  ;;  %1117 = vst [vmem:[#allocation5 + $0xc0] sm:$0xff] %v1431_v58  ;;  %1452 = vpow2.f32 %v955_v20  ;;  %v802_v31 = vadd.f32 %v1842_v44, %v1856_v33  ;;  %v730_v32 = vadd.f32 %v1853_v12, %v1851_v61  ;;  %v732_v43 = vadd.f32 %v1858_v3, %v1863_v5 }
 0x2e4   :  { %v1435_v63 = vpop.eup %1434  ;;  %1121 = vst [vmem:[#allocation5 + $0xe0] sm:$0xff] %v1433_v55  ;;  %1454 = vpow2.f32 %v959_v22  ;;  %v799_v55 = vadd.f32 %v1831_v29, %v1856_v33  ;;  %v895_v59 = vmul.f32 1.442695, %v826_v51  ;;  %v831_v62 = vsub.f32 0.0, %v720_v47 }
 0x2e5   :  { %v1437_v4 = vpop.eup %1436  ;;  %1123 = vst [vmem:[#allocation5 + $0xf0] sm:$0xff] %v1435_v63  ;;  %1456 = vpow2.f32 %v967_v52  ;;  %v839_v44 = vsub.f32 0.0, %v726_v10  ;;  %v734_v33 = vadd.f32 %v1865_v8, %v1851_v61  ;;  %v736_v41 = vadd.f32 %v1869_v15, %v1863_v5 }
 0x2e6   :  { %v1439_v17 = vpop.eup %1438  ;;  %1122 = vst [vmem:[#allocation5 + $0xe8] sm:$0xff] %v1437_v4  ;;  %1458 = vpow2.f32 %v971_v54  ;;  %v722_v54 = vadd.f32 %v1829_v28, %v1863_v5  ;;  %v905_v14 = vmul.f32 1.442695, %v831_v62 }
 0x2e7   :  { %v1441_v13 = vpop.eup %1440  ;;  %1124 = vst [vmem:[#allocation5 + $0xf8] sm:$0xff] %v1439_v17  ;;  %1460 = vpow2.f32 %v969_v57  ;;  %v921_v8 = vmul.f32 1.442695, %v839_v44  ;;  %v853_v15 = vsub.f32 0.0, %v736_v41 }
 0x2e8   :  { %v1443_v16 = vpop.eup %1442  ;;  %1128 = vst [vmem:[#allocation5 + $0x118] sm:$0xff] %v1441_v13  ;;  %1462 = vpow2.f32 %v973_v0  ;;  %v861_v0 = vsub.f32 0.0, %v807_v7 }
 0x2e9   :  { %v1445_v20 = vpop.eup %1444  ;;  %1130 = vst [vmem:[#allocation5 + $0x128] sm:$0xff] %v1443_v16  ;;  %1464 = vpow2.f32 %v877_v2  ;;  %v832_v2 = vsub.f32 0.0, %v722_v54 }
 0x2ea   :  { %v1447_v36 = vpop.eup %1446  ;;  %1129 = vst [vmem:[#allocation5 + $0x120] sm:$0xff] %v1445_v20  ;;  %1466 = vpow2.f32 %v909_v9  ;;  %v847_v9 = vsub.f32 0.0, %v799_v55  ;;  %v838_v20 = vsub.f32 0.0, %v724_v1 }
 0x2eb   :  { %v1449_v22 = vpop.eup %1448  ;;  %1131 = vst [vmem:[#allocation5 + $0x130] sm:$0xff] %v1447_v36  ;;  %1468 = vpow2.f32 %v879_v6  ;;  %v965_v36 = vmul.f32 1.442695, %v861_v0 }
 0x2ec   :  { %v1451_v27 = vpop.eup %1450  ;;  %1135 = vst [vmem:[#allocation5 + $0x150] sm:$0xff] %v1449_v22  ;;  %1470 = vpow2.f32 %v881_v19  ;;  %v937_v12 = vmul.f32 1.442695, %v847_v9  ;;  %v919_v3 = vmul.f32 1.442695, %v838_v20  ;;  %v744_v9 = vadd.f32 %v1889_v53, %v1851_v61 }
 0x2ed   :  { %v1453_v30 = vpop.eup %1452  ;;  %1137 = vst [vmem:[#allocation5 + $0x160] sm:$0xff] %v1451_v27  ;;  %1472 = vpow2.f32 %v891_v40 }
 0x2ee   :  { %v1455_v23 = vpop.eup %1454  ;;  %v1024_v34 = vadd.f32 1.0, %v1453_v30  ;;  %1474 = vpow2.f32 %v923_v18  ;;  %v868_v18 = vsub.f32 0.0, %v810_v39  ;;  %v854_v30 = vsub.f32 0.0, %v802_v31 }
 0x2ef   :  { %v1457_v35 = vpop.eup %1456  ;;  %v1026_v37 = vadd.f32 1.0, %v1455_v23  ;;  %1476 = vpow2.f32 %v893_v25  ;;  %v907_v25 = vmul.f32 1.442695, %v832_v2  ;;  %v742_v39 = vadd.f32 %v1885_v49, %v1863_v5 }
 0x2f0   :  { %v1459_v42 = vpop.eup %1458  ;;  %1478 = vrcp.f32 %v1024_v34  ;;  %v1030_v24 = vadd.f32 1.0, %v1457_v35  ;;  %v845_v34 = vsub.f32 0.0, %v730_v32  ;;  %v951_v51 = vmul.f32 1.442695, %v854_v30 }
 0x2f1   :  { %v1461_v38 = vpop.eup %1460  ;;  %1480 = vrcp.f32 %v1026_v37  ;;  %v1032_v45 = vadd.f32 1.0, %v1459_v42  ;;  %v979_v37 = vmul.f32 1.442695, %v868_v18  ;;  %v846_v42 = vsub.f32 0.0, %v732_v43 }
 0x2f2   :  { %v1463_v52 = vpop.eup %1462  ;;  %1482 = vrcp.f32 %v1030_v24  ;;  %v1031_v48 = vadd.f32 1.0, %v1461_v38  ;;  %v852_v38 = vsub.f32 0.0, %v734_v33  ;;  %v860_v49 = vsub.f32 0.0, %v742_v39 }
 0x2f3   :  { %v1465_v50 = vpop.eup %1464  ;;  %1484 = vrcp.f32 %v1032_v45  ;;  %v1033_v58 = vadd.f32 1.0, %v1463_v52  ;;  %v933_v52 = vmul.f32 1.442695, %v845_v34  ;;  %v935_v7 = vmul.f32 1.442695, %v846_v42 }
 0x2f4   :  { %v1467_v11 = vpop.eup %1466  ;;  %1486 = vrcp.f32 %v1031_v48  ;;  %v985_v56 = vadd.f32 1.0, %v1465_v50 }
 0x2f5   :  { %v1469_v57 = vpop.eup %1468  ;;  %1488 = vrcp.f32 %v1033_v58  ;;  %v1001_v21 = vadd.f32 1.0, %v1467_v11  ;;  %v947_v58 = vmul.f32 1.442695, %v852_v38  ;;  %v949_v11 = vmul.f32 1.442695, %v853_v15 }
 0x2f6   :  { %v1471_v63 = vpop.eup %1470  ;;  %1490 = vrcp.f32 %v985_v56  ;;  %v986_v26 = vadd.f32 1.0, %v1469_v57 }
 0x2f7   :  { %v1473_v4 = vpop.eup %1472  ;;  %1492 = vrcp.f32 %v1001_v21  ;;  %v987_v28 = vadd.f32 1.0, %v1471_v63 }
 0x2f8   :  { %v1475_v29 = vpop.eup %1474  ;;  %1494 = vrcp.f32 %v986_v26  ;;  %v992_v17 = vadd.f32 1.0, %v1473_v4  ;;  %v740_v4 = vadd.f32 %v1881_v46, %v1851_v61 }
 0x2f9   :  { %v1477_v13 = vpop.eup %1476  ;;  %1496 = vrcp.f32 %v987_v28  ;;  %v1008_v6 = vadd.f32 1.0, %v1475_v29 }
 0x2fa   :  { %v1479_v16 = vpop.eup %1478  ;;  %1498 = vrcp.f32 %v992_v17  ;;  %v993_v19 = vadd.f32 1.0, %v1477_v13  ;;  %v859_v31 = vsub.f32 0.0, %v740_v4 }
 0x2fb   :  { %v1481_v40 = vpop.eup %1480  ;;  %1136 = vst [vmem:[#allocation5 + $0x158] sm:$0xff] %v1479_v16  ;;  %1500 = vrcp.f32 %v1008_v6  ;;  %v746_v6 = vadd.f32 %v1893_v60, %v1863_v5 }
 0x2fc   :  { %v1483_v22 = vpop.eup %1482  ;;  %1138 = vst [vmem:[#allocation5 + $0x168] sm:$0xff] %v1481_v40  ;;  %1502 = vrcp.f32 %v993_v19  ;;  %v866_v40 = vsub.f32 0.0, %v744_v9  ;;  %v961_v5 = vmul.f32 1.442695, %v859_v31 }
 0x2fd   :  { %v1485_v27 = vpop.eup %1484  ;;  %1142 = vst [vmem:[#allocation5 + $0x188] sm:$0xff] %v1483_v22  ;;  %1504 = vpow2.f32 %v895_v59  ;;  %v867_v53 = vsub.f32 0.0, %v746_v6 }
 0x2fe   :  { %v1487_v23 = vpop.eup %1486  ;;  %1144 = vst [vmem:[#allocation5 + $0x198] sm:$0xff] %v1485_v27  ;;  %1506 = vpow2.f32 %v905_v14  ;;  %v975_v33 = vmul.f32 1.442695, %v866_v40 }
 0x2ff   :  { %v1489_v35 = vpop.eup %1488  ;;  %1143 = vst [vmem:[#allocation5 + $0x190] sm:$0xff] %v1487_v23  ;;  %1508 = vpow2.f32 %v965_v36 }
 0x300   :  { %v1491_v24 = vpop.eup %1490  ;;  %1145 = vst [vmem:[#allocation5 + $0x1a0] sm:$0xff] %v1489_v35  ;;  %1510 = vpow2.f32 %v907_v25  ;;  %v963_v25 = vmul.f32 1.442695, %v860_v49 }
 0x301   :  { %v1493_v45 = vpop.eup %1492  ;;  %1097 = vst [vmem:[#allocation5 + $0x20] sm:$0xff] %v1491_v24  ;;  %1512 = vpow2.f32 %v937_v12  ;;  %v977_v12 = vmul.f32 1.442695, %v867_v53 }
 0x302   :  { %v1495_v47 = vpop.eup %1494  ;;  %1113 = vst.msk [vmem:[#allocation5 + $0xa0] sm:$0xff] %vm85_vm0, %v1493_v45  ;;  %1514 = vpow2.f32 %v919_v3 }
 0x303   :  { %v1497_v48 = vpop.eup %1496  ;;  %1098 = vst [vmem:[#allocation5 + $0x28] sm:$0xff] %v1495_v47  ;;  %1516 = vpow2.f32 %v979_v37 }
 0x304   :  { %v1499_v50 = vpop.eup %1498  ;;  %1099 = vst.msk [vmem:[#allocation5 + $0x30] sm:$0xff] %vm85_vm0, %v1497_v48  ;;  %1518 = vpow2.f32 %v921_v8 }
 0x305   :  { %v1501_v54 = vpop.eup %1500  ;;  %1104 = vst [vmem:[#allocation5 + $0x58] sm:$0xff] %v1499_v50  ;;  %1520 = vpow2.f32 %v951_v51 }
 0x306   :  { %v1503_v56 = vpop.eup %1502  ;;  %1120 = vst.msk [vmem:[#allocation5 + $0xd8] sm:$0xff] %vm85_vm0, %v1501_v54  ;;  %1522 = vpow2.f32 %v933_v52 }
 0x307   :  { %v1505_v55 = vpop.eup %1504  ;;  %1105 = vst [vmem:[#allocation5 + $0x60] sm:$0xff] %v1503_v56  ;;  %1524 = vpow2.f32 %v935_v7 }
 0x308   :  { %v1507_v57 = vpop.eup %1506  ;;  %v994_v21 = vadd.f32 1.0, %v1505_v55  ;;  %1526 = vpow2.f32 %v947_v58 }
 0x309   :  { %v1509_v59 = vpop.eup %1508  ;;  %v999_v62 = vadd.f32 1.0, %v1507_v57  ;;  %1528 = vpow2.f32 %v949_v11 }
 0x30a   :  { %v1511_v63 = vpop.eup %1510  ;;  %1530 = vrcp.f32 %v994_v21  ;;  %v1029_v26 = vadd.f32 1.0, %v1509_v59 }
 0x30b   :  { %v1513_v0 = vpop.eup %1512  ;;  %1532 = vrcp.f32 %v999_v62  ;;  %v1000_v1 = vadd.f32 1.0, %v1511_v63 }
 0x30c   :  { %v1515_v28 = vpop.eup %1514  ;;  %1534 = vrcp.f32 %v1029_v26  ;;  %v1015_v2 = vadd.f32 1.0, %v1513_v0 }
 0x30d   :  { %v1517_v29 = vpop.eup %1516  ;;  %1536 = vrcp.f32 %v1000_v1  ;;  %v1006_v17 = vadd.f32 1.0, %v1515_v28 }
 0x30e   :  { %v1519_v10 = vpop.eup %1518  ;;  %1538 = vrcp.f32 %v1015_v2  ;;  %v1036_v13 = vadd.f32 1.0, %v1517_v29 }
 0x30f   :  { %v1521_v14 = vpop.eup %1520  ;;  %1540 = vrcp.f32 %v1006_v17  ;;  %v1007_v46 = vadd.f32 1.0, %v1519_v10 }
 0x310   :  { %v1523_v16 = vpop.eup %1522  ;;  %1542 = vrcp.f32 %v1036_v13  ;;  %v1022_v19 = vadd.f32 1.0, %v1521_v14 }
 0x311   :  { %v1525_v20 = vpop.eup %1524  ;;  %1544 = vrcp.f32 %v1007_v46  ;;  %v1013_v32 = vadd.f32 1.0, %v1523_v16 }
 0x312   :  { %v1527_v36 = vpop.eup %1526  ;;  %1546 = vrcp.f32 %v1022_v19  ;;  %v1014_v61 = vadd.f32 1.0, %v1525_v20 }
 0x313   :  { %v1529_v18 = vpop.eup %1528  ;;  %1548 = vrcp.f32 %v1013_v32  ;;  %v1020_v43 = vadd.f32 1.0, %v1527_v36 }
 0x314   :  { %v1531_v60 = vpop.eup %1530  ;;  %1550 = vrcp.f32 %v1014_v61  ;;  %v1021_v22 = vadd.f32 1.0, %v1529_v18 }
 0x315   :  { %v1533_v44 = vpop.eup %1532  ;;  %1106 = vst.msk [vmem:[#allocation5 + $0x68] sm:$0xff] %vm85_vm0, %v1531_v60  ;;  %1552 = vrcp.f32 %v1020_v43 }
 0x316   :  { %v1535_v27 = vpop.eup %1534  ;;  %1111 = vst [vmem:[#allocation5 + $0x90] sm:$0xff] %v1533_v44  ;;  %1554 = vrcp.f32 %v1021_v22 }
 0x317   :  { %v1537_v30 = vpop.eup %1536  ;;  %1141 = vst.msk [vmem:[#allocation5 + $0x180] sm:$0xff] %vm85_vm0, %v1535_v27  ;;  %1556 = vpow2.f32 %v961_v5 }
 0x318   :  { %v1539_v41 = vpop.eup %1538  ;;  %1112 = vst [vmem:[#allocation5 + $0x98] sm:$0xff] %v1537_v30  ;;  %1558 = vpow2.f32 %v963_v25 }
 0x319   :  { %v1541_v23 = vpop.eup %1540  ;;  %1127 = vst.msk [vmem:[#allocation5 + $0x110] sm:$0xff] %vm85_vm0, %v1539_v41  ;;  %1560 = vpow2.f32 %v975_v33 }
 0x31a   :  { %v1543_v3 = vpop.eup %1542  ;;  %1118 = vst [vmem:[#allocation5 + $0xc8] sm:$0xff] %v1541_v23  ;;  %1562 = vpow2.f32 %v977_v12 }
 0x31b   :  { %v1545_v34 = vpop.eup %1544  ;;  %1148 = vst.msk [vmem:[#allocation5 + $0x1b8] sm:$0xff] %vm85_vm0, %v1543_v3 }
 0x31c   :  { %v1547_v35 = vpop.eup %1546  ;;  %1119 = vst [vmem:[#allocation5 + $0xd0] sm:$0xff] %v1545_v34 }
 0x31d   :  { %v1549_v37 = vpop.eup %1548  ;;  %1134 = vst.msk [vmem:[#allocation5 + $0x148] sm:$0xff] %vm85_vm0, %v1547_v35 }
 0x31e   :  { %v1551_v42 = vpop.eup %1550  ;;  %1125 = vst [vmem:[#allocation5 + $0x100] sm:$0xff] %v1549_v37 }
 0x31f   :  { %v1553_v24 = vpop.eup %1552  ;;  %1126 = vst [vmem:[#allocation5 + $0x108] sm:$0xff] %v1551_v42 }
 0x320   :  { %v1555_v8 = vpop.eup %1554  ;;  %1132 = vst [vmem:[#allocation5 + $0x138] sm:$0xff] %v1553_v24 }
 0x321   :  { %v1557_v38 = vpop.eup %1556  ;;  %1133 = vst [vmem:[#allocation5 + $0x140] sm:$0xff] %v1555_v8 }
 0x322   :  { %v1559_v45 = vpop.eup %1558  ;;  %v1027_v51 = vadd.f32 1.0, %v1557_v38 }
 0x323   :  { %v1561_v15 = vpop.eup %1560  ;;  %v1028_v47 = vadd.f32 1.0, %v1559_v45 }
 0x324   :  { %v1563_v52 = vpop.eup %1562  ;;  %1564 = vrcp.f32 %v1027_v51  ;;  %v1034_v48 = vadd.f32 1.0, %v1561_v15 }
 0x325   :  { %1566 = vrcp.f32 %v1028_v47  ;;  %v1035_v7 = vadd.f32 1.0, %v1563_v52 }
 0x326   :  { %1568 = vrcp.f32 %v1034_v48 }
 0x327   :  { %1570 = vrcp.f32 %v1035_v7 }
 0x32e   :  { %v1565_v50 = vpop.eup %1564 }
 0x32f   :  { %v1567_v58 = vpop.eup %1566  ;;  %1139 = vst [vmem:[#allocation5 + $0x170] sm:$0xff] %v1565_v50 }
 0x330   :  { %v1569_v54 = vpop.eup %1568  ;;  %1140 = vst [vmem:[#allocation5 + $0x178] sm:$0xff] %v1567_v58 }
 0x331   :  { %v1571_v11 = vpop.eup %1570  ;;  %1146 = vst [vmem:[#allocation5 + $0x1a8] sm:$0xff] %v1569_v54 }
 0x332   :  { %1147 = vst [vmem:[#allocation5 + $0x1b0] sm:$0xff] %v1571_v11 }
 0x333   :  { %1605 = shalt.err (!%p1602_p12)
}
 0x334   :  { %s1606_s14 = scalar_lea.hbm %s1956_s7, 7168 }
 0x335   :  { %p1607_p13 = scmp.ne.s32.totalorder %s1956_s7, %s1606_s14  ;;  %p1610_p0 = scmp.lt.u32.totalorder %s1606_s14, %s1956_s7 }
 0x337   :  { %p1612_p1 = pnand %p1610_p0, %p1607_p13 }
 0x339   :  { %1615 = shalt.err (!%p1612_p1)
}
 0x33a   :  { %s1625_s19 = smov 896   ;;  %s1626_s20 = smov 56  }
 0x33b   :  { %1160 = dma.vmem_to_hbm [thread:$0]  %s1155_s10, 7168, %s1956_s7, [#allocation4], %s1625_s19, %s1625_s19, %s1626_s20  }
 0x33c   :  { %1618 = dma.done.wait [#allocation4], 7168  }
 0x33d   :  { %1619 = vsyncadd [#allocation4], 4294960128 }
 0x33e   :  { %1164 = vsyncpa [#allocation3], 1 }
 0x33f   :  { %1165 = vsyncpa [#allocation4], 1 }

</bundles_post_ra>
